<compile_context>
chip_gen: v6e
topology: v6e:2x2x1
jax: 0.10.0
libtpu: 0.0.40
codegen_flags: <defaults>
</compile_context>

<pallas_src>
import functools

import jax
import jax.numpy as jnp
from jax.experimental import pallas as pl
from jax.experimental.pallas import tpu as pltpu


# --------------------- pass 1: conv (im2col matmul) + BN partial stats ---------------------

def _conv_stats_kernel(x_ref, w2_ref, conv_ref, psum_ref, psumsq_ref,
                       *, K, dilation, pad, L_out):
    """One batch sample per grid step.

    x_ref    : (1, C_in, L)       input sample (native dtype)
    w2_ref   : (C_out, K*C_in)    weights pre-flattened tap-major in the wrapper
    conv_ref : (1, C_out, L_out)  f32 conv output (HBM intermediate for pass 2)
    psum_ref / psumsq_ref : (1, C_out, 1)  per-sample partial BN statistics
    """
    x = x_ref[0]                                          # (C_in, L)
    c_in = x.shape[0]

    # Zero padding built in-register (no extra HBM copy of x in the wrapper).
    if pad > 0:
        z = jnp.zeros((c_in, pad), x.dtype)
        xp = jnp.concatenate([z, x, z], axis=-1)          # (C_in, L + 2*pad)
    else:
        xp = x

    # im2col: stack the K dilated taps along the channel (sublane) axis so the whole
    # dilated conv is a single MXU matmul with contraction dim K*C_in.
    xt = jnp.concatenate(
        [xp[:, k * dilation: k * dilation + L_out] for k in range(K)], axis=0)  # (K*C_in, L_out)

    conv = jnp.dot(w2_ref[...], xt, preferred_element_type=jnp.float32)  # (C_out, L_out) f32

    # NOTE: conv bias intentionally NOT added -- BatchNorm with batch statistics
    # (track_running_stats=False) subtracts it out exactly.
    conv_ref[0] = conv

    # Per-sample partial stats; reduced across samples in the wrapper (keeps this
    # grid axis "parallel" instead of forcing a sequential accumulator).
    psum_ref[0] = jnp.sum(conv, axis=1, keepdims=True)             # (C_out, 1)
    psumsq_ref[0] = jnp.sum(conv * conv, axis=1, keepdims=True)    # (C_out, 1)

    # TODO(synk): for very long L, add an L-tile grid axis with halo DMA (manual
    # make_async_copy) instead of a full-L block per sample.


# -------------------- pass 2: BN affine + ReLU + MaxPool1d(2) + Dropout --------------------

def _bn_relu_pool_kernel(conv_ref, scale_ref, shift_ref, out_ref, *, downsample):
    scale = scale_ref[...]                     # (C_out, 1) f32, = gamma * inv_std
    shift = shift_ref[...]                     # (C_out, 1) f32, = beta - mean * scale
    y = conv_ref[0] * scale + shift            # BN folded into one per-channel FMA
    y = jnp.maximum(y, 0.0)                    # ReLU
    if downsample:                             # MaxPool1d(kernel=2, stride=2)
        lt_out = out_ref.shape[2]
        # TODO(synk): swap the trailing-2 reshape for even/odd strided loads
        # (ref[pl.ds(..., stride=2)]) once validated on the target Mosaic build.
        y = jnp.max(y[:, : 2 * lt_out].reshape(y.shape[0], lt_out, 2), axis=-1)
    # Dropout: identity in eval mode.
    # TODO(synk): training-mode stochastic dropout (pltpu.prng_*) not implemented.
    out_ref[0] = y.astype(out_ref.dtype)


# ------------------------------------- wrapper ---------------------------------------------

def _pick_l_tile(n, target=512):
    """Lane-dense L tile: full length if small, else a multiple of 128 dividing n."""
    if n <= target:
        return n
    t = target - (target % 128)
    while t >= 128:
        if n % t == 0:
            return t
        t -= 128
    return n


def conv_block(x, w, b, gamma, beta, *, dilation, downsample, eps=1e-5):
    """x: (N, C_in, L); w: (C_out, C_in, K); b/gamma/beta: (C_out,). Returns (N, C_out, L_final)."""
    del b  # Cancels exactly under batch-statistics BatchNorm (keep it if running stats are used).
    N, C_in, L = x.shape
    C_out, _, K = w.shape
    pad = dilation * (K - 1) // 2
    L_out = L + 2 * pad - dilation * (K - 1)
    L_final = (L_out // 2) if downsample else L_out

    # Pre-flatten weights tap-major: w2[o, k*C_in + c] = w[o, c, k].
    # Keeps K off the lane axis and matches the in-kernel tap stacking.
    w2 = jnp.transpose(w, (0, 2, 1)).reshape(C_out, K * C_in)

    itemsize = x.dtype.itemsize

    # ---- pass 1: conv + per-sample BN partial statistics ----
    conv_out, psum, psumsq = pl.pallas_call(
        functools.partial(_conv_stats_kernel, K=K, dilation=dilation, pad=pad, L_out=L_out),
        grid=(N,),
        in_specs=(
            pl.BlockSpec((1, C_in, L), lambda n: (n, 0, 0)),
            pl.BlockSpec((C_out, K * C_in), lambda n: (0, 0)),
        ),
        out_specs=(
            pl.BlockSpec((1, C_out, L_out), lambda n: (n, 0, 0)),
            pl.BlockSpec((1, C_out, 1), lambda n: (n, 0, 0)),
            pl.BlockSpec((1, C_out, 1), lambda n: (n, 0, 0)),
        ),
        out_shape=(
            jax.ShapeDtypeStruct((N, C_out, L_out), jnp.float32),
            jax.ShapeDtypeStruct((N, C_out, 1), jnp.float32),
            jax.ShapeDtypeStruct((N, C_out, 1), jnp.float32),
        ),
        compiler_params=pltpu.CompilerParams(
            dimension_semantics=("parallel",),
            vmem_limit_bytes=32 * 1024 * 1024),   # within v5e/v6e/v7x scoped limits
        cost_estimate=pl.CostEstimate(
            flops=2 * N * C_out * K * C_in * L_out,
            transcendentals=0,
            bytes_accessed=N * C_in * L * itemsize + C_out * K * C_in * itemsize
                           + 4 * N * C_out * (L_out + 2)),
    )(x, w2)

    # ---- tiny JAX glue: reduce stats, fold BN into a single per-channel FMA ----
    cnt = jnp.float32(N * L_out)
    mean = jnp.sum(psum, axis=0) / cnt                                       # (C_out, 1)
    var = jnp.maximum(jnp.sum(psumsq, axis=0) / cnt - mean * mean, 0.0)      # biased variance
    inv_std = jax.lax.rsqrt(var + eps)
    scale = gamma.reshape(C_out, 1).astype(jnp.float32) * inv_std
    shift = beta.reshape(C_out, 1).astype(jnp.float32) - mean * scale

    # ---- pass 2: normalize + ReLU + pool, tiled over (batch, L) ----
    lt_out = _pick_l_tile(L_final)
    n_lt = L_final // lt_out
    if downsample:
        lt_in = L_out if n_lt == 1 else 2 * lt_out
    else:
        lt_in = lt_out

    out = pl.pallas_call(
        functools.partial(_bn_relu_pool_kernel, downsample=downsample),
        grid=(N, n_lt),
        in_specs=(
            pl.BlockSpec((1, C_out, lt_in), lambda n, j: (n, 0, j)),
            pl.BlockSpec((C_out, 1), lambda n, j: (0, 0)),
            pl.BlockSpec((C_out, 1), lambda n, j: (0, 0)),
        ),
        out_specs=pl.BlockSpec((1, C_out, lt_out), lambda n, j: (n, 0, j)),
        out_shape=jax.ShapeDtypeStruct((N, C_out, L_final), x.dtype),
        compiler_params=pltpu.CompilerParams(
            dimension_semantics=("parallel", "parallel"),
            vmem_limit_bytes=32 * 1024 * 1024),
        cost_estimate=pl.CostEstimate(
            flops=3 * N * C_out * L_out,
            transcendentals=0,
            bytes_accessed=4 * N * C_out * L_out + N * C_out * L_final * itemsize),
    )(conv_out, scale, shift)
    return out


# --------------------------------- reference (pure JAX) ------------------------------------

def _reference(x, w, b, gamma, beta, *, dilation, downsample, eps=1e-5):
    K = w.shape[-1]
    pad = dilation * (K - 1) // 2
    y = jax.lax.conv_general_dilated(
        x.astype(jnp.float32), w.astype(jnp.float32),
        window_strides=(1,), padding=[(pad, pad)], rhs_dilation=(dilation,),
        dimension_numbers=('NCH', 'OIH', 'NCH')) + b[None, :, None]
    mean = y.mean(axis=(0, 2), keepdims=True)
    var = ((y - mean) ** 2).mean(axis=(0, 2), keepdims=True)
    y = (y - mean) / jnp.sqrt(var + eps) * gamma[None, :, None] + beta[None, :, None]
    y = jnp.maximum(y, 0.0)
    if downsample:
        N, C, Ly = y.shape
        y = y[:, :, : 2 * (Ly // 2)].reshape(N, C, Ly // 2, 2).max(-1)
    return y


if __name__ == "__main__":
    # ConvBlock(in_channels=4, out_channels=8, kernel_size=3,
    #           dropout_rate=0.1, dilation_rate=2, downsample=True)
    N, C_in, C_out, L, K, dilation = 2, 4, 8, 16, 3, 2
    downsample = True

    key = jax.random.PRNGKey(0)
    kx, kw, kb, kg, kbt = jax.random.split(key, 5)
    x = jax.random.normal(kx, (N, C_in, L), dtype=jnp.float32)
    w = jax.random.normal(kw, (C_out, C_in, K), dtype=jnp.float32) * 0.1
    b = jax.random.normal(kb, (C_out,), dtype=jnp.float32) * 0.1
    gamma = 1.0 + 0.1 * jax.random.normal(kg, (C_out,), dtype=jnp.float32)
    beta = 0.1 * jax.random.normal(kbt, (C_out,), dtype=jnp.float32)

    fn = jax.jit(functools.partial(conv_block, dilation=dilation, downsample=downsample))
    out = jax.block_until_ready(fn(x, w, b, gamma, beta))

    ref = _reference(x, w, b, gamma, beta, dilation=dilation, downsample=downsample)
    assert out.shape == ref.shape, (out.shape, ref.shape)
    err = float(jnp.max(jnp.abs(out - ref)))
    assert jnp.allclose(out, ref, atol=1e-4, rtol=1e-4), err
    print("KERNEL_OK")
</pallas_src>

<mosaic_0001>
module attributes {stable_mosaic.version = 11 : i64} {
  func.func @_conv_stats_kernel(%arg0: i32, %arg1: memref<1x4x16xf32, #tpu.memory_space<vmem>>, %arg2: memref<8x12xf32, #tpu.memory_space<vmem>>, %arg3: memref<1x8x16xf32, #tpu.memory_space<vmem>>, %arg4: memref<1x8x1xf32, #tpu.memory_space<vmem>>, %arg5: memref<1x8x1xf32, #tpu.memory_space<vmem>>) attributes {dimension_semantics = [#tpu.dimension_semantics<parallel>], iteration_bounds = array<i64: 2>, scalar_prefetch = 0 : i64, scratch_operands = 0 : i64, tpu.core_type = #tpu.core_type<tc>, window_params = [{transform_indices = @transform_0, window_bounds = array<i64: 1, 4, 16>}, {pipeline_mode = #tpu.pipeline_mode<synchronous>, transform_indices = @transform_1, window_bounds = array<i64: 8, 12>}, {transform_indices = @transform_2, window_bounds = array<i64: 1, 8, 16>}, {transform_indices = @transform_3, window_bounds = array<i64: 1, 8, 1>}, {transform_indices = @transform_4, window_bounds = array<i64: 1, 8, 1>}]} {
    %c0 = arith.constant 0 : index
    %c0_0 = arith.constant 0 : index
    %c0_1 = arith.constant 0 : index
    %0 = vector.load %arg1[%c0, %c0_0, %c0_1] : memref<1x4x16xf32, #tpu.memory_space<vmem>>, vector<1x4x16xf32>
    %1 = vector.shape_cast %0 : vector<1x4x16xf32> to vector<4x16xf32>
    %cst = arith.constant 0.000000e+00 : f32
    %2 = vector.broadcast %cst : f32 to vector<4x2xf32>
    %3 = tpu.concatenate %2, %1, %2 in 1 : vector<4x2xf32>, vector<4x16xf32>, vector<4x2xf32> -> vector<4x20xf32>
    %4 = vector.extract_strided_slice %3 {offsets = [0, 0], sizes = [4, 16], strides = [1, 1]} : vector<4x20xf32> to vector<4x16xf32>
    %5 = vector.extract_strided_slice %3 {offsets = [0, 2], sizes = [4, 16], strides = [1, 1]} : vector<4x20xf32> to vector<4x16xf32>
    %6 = vector.extract_strided_slice %3 {offsets = [0, 4], sizes = [4, 16], strides = [1, 1]} : vector<4x20xf32> to vector<4x16xf32>
    %7 = tpu.concatenate %4, %5, %6 in 0 : vector<4x16xf32>, vector<4x16xf32>, vector<4x16xf32> -> vector<12x16xf32>
    %c0_2 = arith.constant 0 : index
    %c0_3 = arith.constant 0 : index
    %8 = vector.load %arg2[%c0_2, %c0_3] : memref<8x12xf32, #tpu.memory_space<vmem>>, vector<8x12xf32>
    %cst_4 = arith.constant dense<0.000000e+00> : vector<8x16xf32>
    %9 = tpu.matmul %8, %7, %cst_4 {dimension_numbers = #tpu.dot_dimension_numbers<[1], [0], [0], [1], [0, 0, 1, 1], [], []>} : vector<8x12xf32>, vector<12x16xf32>, vector<8x16xf32> -> vector<8x16xf32>
    %c0_5 = arith.constant 0 : index
    %c0_6 = arith.constant 0 : index
    %c0_7 = arith.constant 0 : index
    %10 = vector.load %arg3[%c0_5, %c0_6, %c0_7] : memref<1x8x16xf32, #tpu.memory_space<vmem>>, vector<1x8x16xf32>
    %11 = vector.shape_cast %10 : vector<1x8x16xf32> to vector<8x16xf32>
    %12 = vector.shape_cast %9 : vector<8x16xf32> to vector<1x8x16xf32>
    tpu.vector_store %arg3[%c0_5, %c0_6, %c0_7], %12 {strides = array<i32>} : memref<1x8x16xf32, #tpu.memory_space<vmem>>, vector<1x8x16xf32>,
    %cst_8 = arith.constant dense<0.000000e+00> : vector<8xf32>
    %13 = vector.multi_reduction <add>, %9, %cst_8 [1] : vector<8x16xf32> to vector<8xf32>
    %14 = vector.shape_cast %13 : vector<8xf32> to vector<8x1xf32>
    %c0_9 = arith.constant 0 : index
    %c0_10 = arith.constant 0 : index
    %c0_11 = arith.constant 0 : index
    %15 = vector.load %arg4[%c0_9, %c0_10, %c0_11] : memref<1x8x1xf32, #tpu.memory_space<vmem>>, vector<1x8x1xf32>
    %16 = vector.shape_cast %15 : vector<1x8x1xf32> to vector<8x1xf32>
    %17 = vector.shape_cast %14 : vector<8x1xf32> to vector<1x8x1xf32>
    tpu.vector_store %arg4[%c0_9, %c0_10, %c0_11], %17 {strides = array<i32>} : memref<1x8x1xf32, #tpu.memory_space<vmem>>, vector<1x8x1xf32>,
    %18 = arith.mulf %9, %9 : vector<8x16xf32>
    %cst_12 = arith.constant dense<0.000000e+00> : vector<8xf32>
    %19 = vector.multi_reduction <add>, %18, %cst_12 [1] : vector<8x16xf32> to vector<8xf32>
    %20 = vector.shape_cast %19 : vector<8xf32> to vector<8x1xf32>
    %c0_13 = arith.constant 0 : index
    %c0_14 = arith.constant 0 : index
    %c0_15 = arith.constant 0 : index
    %21 = vector.load %arg5[%c0_13, %c0_14, %c0_15] : memref<1x8x1xf32, #tpu.memory_space<vmem>>, vector<1x8x1xf32>
    %22 = vector.shape_cast %21 : vector<1x8x1xf32> to vector<8x1xf32>
    %23 = vector.shape_cast %20 : vector<8x1xf32> to vector<1x8x1xf32>
    tpu.vector_store %arg5[%c0_13, %c0_14, %c0_15], %23 {strides = array<i32>} : memref<1x8x1xf32, #tpu.memory_space<vmem>>, vector<1x8x1xf32>,
    return
  }
  func.func @transform_0(%arg0: i32) -> (i32, i32, i32) {
    %c0_i32 = arith.constant 0 : i32
    %c0_i32_0 = arith.constant 0 : i32
    %c0_i32_1 = arith.constant 0 : i32
    return %arg0, %c0_i32, %c0_i32_0 : i32, i32, i32
  }
  func.func @transform_1(%arg0: i32) -> (i32, i32) {
    %c0_i32 = arith.constant 0 : i32
    %c0_i32_0 = arith.constant 0 : i32
    %c0_i32_1 = arith.constant 0 : i32
    return %c0_i32, %c0_i32_0 : i32, i32
  }
  func.func @transform_2(%arg0: i32) -> (i32, i32, i32) {
    %c0_i32 = arith.constant 0 : i32
    %c0_i32_0 = arith.constant 0 : i32
    %c0_i32_1 = arith.constant 0 : i32
    return %arg0, %c0_i32, %c0_i32_0 : i32, i32, i32
  }
  func.func @transform_3(%arg0: i32) -> (i32, i32, i32) {
    %c0_i32 = arith.constant 0 : i32
    %c0_i32_0 = arith.constant 0 : i32
    %c0_i32_1 = arith.constant 0 : i32
    return %arg0, %c0_i32, %c0_i32_0 : i32, i32, i32
  }
  func.func @transform_4(%arg0: i32) -> (i32, i32, i32) {
    %c0_i32 = arith.constant 0 : i32
    %c0_i32_0 = arith.constant 0 : i32
    %c0_i32_1 = arith.constant 0 : i32
    return %arg0, %c0_i32, %c0_i32_0 : i32, i32, i32
  }
}

module attributes {stable_mosaic.version = 11 : i64} {
  func.func @_bn_relu_pool_kernel(%arg0: i32, %arg1: i32, %arg2: memref<1x8x16xf32, #tpu.memory_space<vmem>>, %arg3: memref<8x1xf32, #tpu.memory_space<vmem>>, %arg4: memref<8x1xf32, #tpu.memory_space<vmem>>, %arg5: memref<1x8x8xf32, #tpu.memory_space<vmem>>) attributes {dimension_semantics = [#tpu.dimension_semantics<parallel>, #tpu.dimension_semantics<parallel>], iteration_bounds = array<i64: 2, 1>, scalar_prefetch = 0 : i64, scratch_operands = 0 : i64, tpu.core_type = #tpu.core_type<tc>, window_params = [{transform_indices = @transform_0, window_bounds = array<i64: 1, 8, 16>}, {pipeline_mode = #tpu.pipeline_mode<synchronous>, transform_indices = @transform_1, window_bounds = array<i64: 8, 1>}, {pipeline_mode = #tpu.pipeline_mode<synchronous>, transform_indices = @transform_2, window_bounds = array<i64: 8, 1>}, {transform_indices = @transform_3, window_bounds = array<i64: 1, 8, 8>}]} {
    %c0 = arith.constant 0 : index
    %c0_0 = arith.constant 0 : index
    %0 = vector.load %arg3[%c0, %c0_0] : memref<8x1xf32, #tpu.memory_space<vmem>>, vector<8x1xf32>
    %c0_1 = arith.constant 0 : index
    %c0_2 = arith.constant 0 : index
    %1 = vector.load %arg4[%c0_1, %c0_2] : memref<8x1xf32, #tpu.memory_space<vmem>>, vector<8x1xf32>
    %c0_3 = arith.constant 0 : index
    %c0_4 = arith.constant 0 : index
    %c0_5 = arith.constant 0 : index
    %2 = vector.load %arg2[%c0_3, %c0_4, %c0_5] : memref<1x8x16xf32, #tpu.memory_space<vmem>>, vector<1x8x16xf32>
    %3 = vector.shape_cast %2 : vector<1x8x16xf32> to vector<8x16xf32>
    %4 = vector.broadcast %0 : vector<8x1xf32> to vector<8x16xf32>
    %5 = arith.mulf %3, %4 : vector<8x16xf32>
    %6 = vector.broadcast %1 : vector<8x1xf32> to vector<8x16xf32>
    %7 = arith.addf %5, %6 : vector<8x16xf32>
    %cst = arith.constant 0.000000e+00 : f32
    %8 = vector.broadcast %cst : f32 to vector<8x16xf32>
    %9 = arith.maximumf %7, %8 : vector<8x16xf32>
    %10 = vector.shape_cast %9 : vector<8x16xf32> to vector<8x8x2xf32>
    %cst_6 = arith.constant dense<0xFF800000> : vector<8x8xf32>
    %11 = vector.multi_reduction <maximumf>, %10, %cst_6 [2] : vector<8x8x2xf32> to vector<8x8xf32>
    %c0_7 = arith.constant 0 : index
    %c0_8 = arith.constant 0 : index
    %c0_9 = arith.constant 0 : index
    %12 = vector.load %arg5[%c0_7, %c0_8, %c0_9] : memref<1x8x8xf32, #tpu.memory_space<vmem>>, vector<1x8x8xf32>
    %13 = vector.shape_cast %12 : vector<1x8x8xf32> to vector<8x8xf32>
    %14 = vector.shape_cast %11 : vector<8x8xf32> to vector<1x8x8xf32>
    tpu.vector_store %arg5[%c0_7, %c0_8, %c0_9], %14 {strides = array<i32>} : memref<1x8x8xf32, #tpu.memory_space<vmem>>, vector<1x8x8xf32>,
    return
  }
  func.func @transform_0(%arg0: i32, %arg1: i32) -> (i32, i32, i32) {
    %c0_i32 = arith.constant 0 : i32
    %c0_i32_0 = arith.constant 0 : i32
    return %arg0, %c0_i32, %arg1 : i32, i32, i32
  }
  func.func @transform_1(%arg0: i32, %arg1: i32) -> (i32, i32) {
    %c0_i32 = arith.constant 0 : i32
    %c0_i32_0 = arith.constant 0 : i32
    %c0_i32_1 = arith.constant 0 : i32
    return %c0_i32, %c0_i32_0 : i32, i32
  }
  func.func @transform_2(%arg0: i32, %arg1: i32) -> (i32, i32) {
    %c0_i32 = arith.constant 0 : i32
    %c0_i32_0 = arith.constant 0 : i32
    %c0_i32_1 = arith.constant 0 : i32
    return %c0_i32, %c0_i32_0 : i32, i32
  }
  func.func @transform_3(%arg0: i32, %arg1: i32) -> (i32, i32, i32) {
    %c0_i32 = arith.constant 0 : i32
    %c0_i32_0 = arith.constant 0 : i32
    return %arg0, %c0_i32, %arg1 : i32, i32, i32
  }
}

</mosaic_0001>

<bundles_post_ra>
// kernel: conv_block.2
= control target key start
LH: loop header
LB: loop body
LE: loop exit
PB: predicated region body
PF: predicated region fallthrough
CT: control target
= control target key end

     0   :  { %s510_s15 = smov 0   ;;  %s536_s0 = inlined_call_operand.vmem [shape: f32[2,4,16], index: 0, kind: input, shape index: {}]   ;;  %s537_s1 = inlined_call_operand.vmem [shape: f32[8,12], index: 1, kind: input, shape index: {}]   ;;  %s538_s2 = inlined_call_operand.vmem [shape: f32[2,8,16], index: 2, kind: output, shape index: {0}]   ;;  %s539_s3 = inlined_call_operand.vmem [shape: f32[2,8,1], index: 3, kind: output, shape index: {1}]   ;;  %s540_s4 = inlined_call_operand.vmem [shape: f32[2,8,1], index: 4, kind: output, shape index: {2}]  }
   0x1 LB: > { %s436_s16 = sadd.s32 4294967295, %s478_s15   ;;  %p440_p0 = scmp.ge.s32.totalorder %s478_s15, 1  ;;  %s478_s15 = sphi %s510_s15, %s15_s15  }
   0x2   : > { %p166_p1 = scmp.lt.s32.totalorder %s478_s15, 3 }
   0x4   : > { %p167_p2 = pnand %p440_p0, %p166_p1 }
   0x5   : > { %p198_p3 = scmp.lt.s32.totalorder (!%p167_p2), %s436_s16, 1  ;;  %s481_s21 = smov (!%p167_p2), 2  }
   0x6   : > { %170 = sbr.rel (%p167_p2) target bundleno = 586 (0x24a), region = 28  ;;  %s483_s22 = smov (!%p167_p2), 124  }
   0x7   : > { %s484_s23 = smov (!%p167_p2), 126  }
   0xb   : > { %v480_v0 = vmov 0.0   ;;  %s542_s16 = smov (!%p198_p3, %s436_s16), 1  ;;  %vm482_vm0 = vmmov 0   ;;  %vm219_vm1 = vcmask 15360   ;;  %vm221_vm2 = vcmask 146432   ;;  %v232_v8 = vld [vmem:[%s537_s1] sm:$0xff] }
   0xc   : > { %452 = vmatprep.subr.mxu0 %v480_v0  ;;  %s441_s17 = sshll.u32 %s542_s16, 2  ;;  %456 = vmatprep.mubr.msk.f32.mxu0 %vm482_vm0, %v480_v0  ;;  %vm230_vm3 = vcmask 1043456   ;;  %vm233_vm4 = vcmask 97280   ;;  %s442_s26 = sshll.u32 %s542_s16, 3  ;;  %vm309_vm5 = vcmask 130048   ;;  %vm314_vm6 = vcmask 7168  }
   0xd   : > { %s201_s20 = scalar_lea.vmem %s536_s0, %s441_s17  ;;  %s205_s29 = scalar_lea.vmem %s538_s2, %s442_s26 }
   0xe   : > { %v214_v1 = vld [vmem:[%s201_s20] sm:$0xf]  ;;  %s209_s6 = scalar_lea.vmem %s539_s3, %s442_s26  ;;  %s213_s9 = scalar_lea.vmem %s540_s4, %s442_s26 }
   0xf   : > { %216 = vrot.lane.b32.xlu0 %v214_v1, %s481_s21 }
  0x81   : > { %v217_v2 = vpop.permute.xlu0 %216 }
  0x82   : > { %v220_v3 = vsel %vm219_vm1, 0.0, %v217_v2 }
  0x83   : > { %v222_v4 = vsel %vm221_vm2, %v220_v3, 0.0 }
  0x84   : > { %228 = vrot.lane.b32.xlu0 %v222_v4, %s483_s22  ;;  %v224_v5 = vrot.slane %v222_v4, 4 }
  0x86   : > { %225 = vrot.lane.b32.xlu1 %v224_v5, %s484_s23 }
  0xf6   : > { %v229_v6 = vpop.permute.xlu0 %228 }
  0xf7   : > { %453 = vmatpush3.msk.msra.mxu0 %vm230_vm3, %v229_v6 }
  0xf8   : > { %v226_v7 = vpop.permute.xlu1 %225  ;;  %454 = vmatprep.subr.mxu0 %v480_v0 }
  0xf9   : > { %v231_v9 = vsel %vm230_vm3, %v222_v4, %v226_v7 }
  0xfa   : > { %455 = vmatpush3.msra.mxu0 %v231_v9 }
  0xfb   : > { %457 = vmatmul.mubr.msk.f32.vlgmr.msra.gmra.mxu0 %vm233_vm4, %v232_v8 }
 0x1bb   : > { %v305_v10 = vpop.f32.mrf.mxu0 }
 0x1bc   : > { %v311_v11 = vsel %vm309_vm5, %v305_v10, 0.0  ;;  %310 = vst.msk [vmem:[%s205_s29] sm:$0xff] %vm309_vm5, %v305_v10  ;;  %v316_v12 = vmul.f32 %v305_v10, %v305_v10 }
 0x1bd   : > { %312 = vadd.xlane.f32.xlu1 %v311_v11  ;;  %v458_v13 = vpop.f32.mrf.mxu0 }
 0x1be   : > { %v317_v14 = vsel %vm309_vm5, %v316_v12, 0.0 }
 0x1bf   : > { %318 = vadd.xlane.f32.xlu0 %v317_v14 }
 0x246   : > { %v313_v15 = vpop.xlane.xlu1 %312 }
 0x247   : > { %315 = vst.msk [vmem:[%s209_s6] sm:$0xff] %vm314_vm6, %v313_v15 }
 0x248   : > { %v319_v16 = vpop.xlane.xlu0 %318 }
 0x249   : > { %320 = vst.msk [vmem:[%s213_s9] sm:$0xff] %vm314_vm6, %v319_v16 }
 0x24a PF: > { %s15_s15 = sadd.s32 1, %s478_s15  }
 0x24b   : > { %p12_p4 = scmp.ge.s32.totalorder %s15_s15, 4  }
 0x24d   :  { %14 = sbr.rel (!%p12_p4) target bundleno = 1 (0x1), region = 82 }

// kernel: conv_block.3
= control target key start
LH: loop header
LB: loop body
LE: loop exit
PB: predicated region body
PF: predicated region fallthrough
CT: control target
= control target key end

     0   :  { %8 = vsyncpa [#allocation3], 0  ;;  %s854_s0 = inlined_call_operand.vmem [shape: f32[2,8,16], index: 0, kind: input, shape index: {}]   ;;  %s855_s1 = inlined_call_operand.vmem [shape: f32[8,1], index: 1, kind: input, shape index: {}]   ;;  %s856_s2 = inlined_call_operand.vmem [shape: f32[8,1], index: 2, kind: input, shape index: {}]   ;;  %s857_s3 = inlined_call_operand.hbm [shape: f32[2,8,8], index: 3, kind: output, shape index: {}]  }
   0x1   :  { %10 = vsyncpa [#allocation3 + $0x1], 0  ;;  %s721_s12 = smov 0   ;;  %s723_s13 = smov 0  }
   0x2   :  { %s725_s14 = smov 0   ;;  %s727_s15 = smov 0  }
   0x3   :  { %s729_s16 = smov 0   ;;  %s731_s17 = smov 0  }
   0x4 LB: > { %s535_s18 = sadd.s32 4294967295, %s688_s17   ;;  %s536_s19 = sadd.s32 4294967294, %s688_s17   ;;  %s688_s17 = sphi %s731_s17, %s16_s17   ;;  %s684_s16 = sphi %s729_s16, %s864_s16   ;;  %s680_s15 = sphi %s727_s15, %s863_s15   ;;  %s676_s14 = sphi %s725_s14, %s862_s14   ;;  %s672_s13 = sphi %s723_s13, %s861_s13   ;;  %s668_s12 = sphi %s721_s12, %s860_s12  }
   0x5   : > { %s28_s20 = sadd.s32 1, %s684_s16  ;;  %s107_s21 = sadd.s32 1, %s676_s14 }
   0x6   : > { %p30_p0 = scmp.ge.s32.totalorder %s28_s20, 2  ;;  %p117_p1 = scmp.ne.s32.totalorder %s676_s14, %s672_s13 }
   0x7   : > { %p118_p2 = scmp.eq.s32.totalorder %s535_s18, 1  ;;  %p123_p3 = scmp.ne.s32.totalorder %s672_s13, %s668_s12 }
   0x8   : > { %s866_s20 = smov (%p30_p0, %s28_s20), 0  ;;  %p124_p5 = scmp.eq.s32.totalorder %s536_s19, 1 }
   0x9   : > { %p761_p4 = por %p118_p2, %p117_p1  ;;  %s102_s23 = ssub.s32 %s684_s16, %s866_s20 }
   0xa   : > { %p539_p6 = scmp.ge.s32.totalorder %s688_s17, 1  ;;  %p105_p7 = scmp.eq.s32.totalorder %s102_s23, 0 }
   0xb   : > { %p768_p8 = por %p124_p5, %p123_p3  ;;  %p158_p9 = scmp.lt.s32.totalorder %s688_s17, 3 }
   0xc   : > { %s774_s25 = scalar_select %p105_p7, %s676_s14, %s107_s21  }
   0xd   : > { %p159_p10 = pnand %p539_p6, %p158_p9 }
   0xe   : > { %p184_p11 = scmp.lt.s32.totalorder (!%p159_p10), %s680_s15, 1  ;;  %s691_s8 = smov (!%p159_p10), 122  }
   0xf   : > { %162 = sbr.rel (%p159_p10) target bundleno = 459 (0x1cb), region = 32  ;;  %s692_s9 = smov (!%p159_p10), 126  }
  0x10   : > { %s693_s10 = smov (!%p159_p10), 118   ;;  %s694_s11 = smov (!%p159_p10), 124  }
  0x11   : > { %s695_s18 = smov (!%p159_p10), 114   ;;  %s696_s19 = smov (!%p159_p10), 120  }
  0x12   : > { %s697_s21 = smov (!%p159_p10), 116   ;;  %s181_s23 = sand.u32 (!%p159_p10), 1, %s672_s13  }
  0x13   : > { %s540_s26 = sshll.u32 (!%p159_p10), %s181_s23, 3  ;;  %s543_s27 = sshll.u32 (!%p159_p10), %s680_s15, 7 }
  0x14   : > { %v191_v0 = vld [vmem:[%s855_s1] sm:$0xff]  ;;  %v690_v1 = vmov 0   ;;  %s185_s30 = scalar_select %p184_p11, %s680_s15, 1  ;;  %v234_v9 = vlaneseq  ;;  %v698_v15 = vmov 1983009808   ;;  %vm365_vm0 = vcmask 15360  }
  0x15   : > { %611 = vset.pattern.permute.xlu0 %v690_v1  ;;  %v192_v2 = vld [vmem:[%s856_s2] sm:$0xff]  ;;  %v232_v16 = vunpack.c.l.s4 %v698_v15  ;;  %v699_v20 = vmov 1934713408   ;;  %vm432_vm1 = vcmask 1041409   ;;  %vm434_vm2 = vcmask 1042434   ;;  %s183_s28 = scalar_lea.vmem [#allocation2], %s540_s26  ;;  %s812_s5 = scalar_lea.hbm %s857_s3, %s543_s27 }
  0x16   : > { %196 = vperm.xlu0 %611, %v191_v0   ;;  %s541_s4 = sshll.u32 %s185_s30, 3  ;;  %v235_v10 = vshrl.u32 %v234_v9, 7  ;;  %v399_v11 = vand.u32 127, %v234_v9  ;;  %v296_v21 = vunpack.c.l.s4 %v699_v20  ;;  %vm436_vm3 = vcmask 1043459   ;;  %s464_s29 = sshll.u32 %s183_s28, 4  ;;  %s465_s29 = int_to_ptr.vmem [resolvable:$true] %s464_s29 }
  0x17   : > { %s190_s7 = scalar_lea.vmem %s854_s0, %s541_s4  ;;  %v233_v19 = vunpack.c.0.s8 %v232_v16  ;;  %vm438_vm4 = vcmask 1044484   ;;  %vm440_vm5 = vcmask 1045509   ;;  %vm442_vm6 = vcmask 1046534   ;;  %s450_s15 = scalar_lea.sflag [#allocation3], %s181_s23 }
  0x18   : > { %v193_v4 = vld [vmem:[%s190_s7] sm:$0xff]  ;;  %v787_v12 = vsub.s32 %v399_v11, %v235_v10  ;;  %v297_v27 = vunpack.c.0.s8 %v296_v21  ;;  %vm444_vm7 = vcmask 1047559   ;;  %vm447_vm8 = vcmask 64512   ;;  %s612_s6 = scalar_lea.vmem %s465_s29, 128  ;;  %s700_s7 = smov [#allocation2]  }
  0x19   : > { %v236_v25 = vsub.s32 %v233_v19, %v235_v10  ;;  %p613_p12 = scmp.ne.s32.totalorder %s465_s29, %s612_s6 }
  0x1a   : > { %202 = vperm.xlu0 %611, %v192_v2   ;;  %v300_v37 = vsub.s32 %v297_v27, %v235_v10 }
  0x1b   : > { %p614_p13 = pnand %p613_p12, %p761_p4 }
  0x1d   : > { %p615_p0 = pneg %p614_p13 }
  0x91   : > { %v197_v3 = vpop.permute.xlu0 %196 }
  0x92   : > { %v199_v5 = vmul.f32 %v197_v3, %v193_v4 }
  0x95   : > { %v203_v6 = vpop.permute.xlu0 %202 }
  0x96   : > { %v205_v7 = vadd.f32 %v203_v6, %v199_v5 }
  0x98   : > { %v206_v8 = vmax.f32 %v205_v7, 0.0 }
  0x9a   : > { %214 = vrot.lane.b32.xlu0 %v206_v8, %s691_s8  ;;  %208 = vrot.lane.b32.xlu1 %v206_v8, %s692_s9  ;;  %s616_s8 = sshll.u32 %s700_s7, 4  ;;  %s617_s8 = int_to_ptr.vmem [resolvable:$false] %s616_s8 }
  0x9b   : > { %s618_s9 = scalar_lea.vmem %s617_s8, 256  ;;  %p619_p1 = scmp.lt.s32.totalorder %s465_s29, %s617_s8 }
  0x9c   : > { %p620_p2 = scmp.lt.s32.totalorder %s618_s9, %s612_s6 }
  0x9e   : > { %220 = vrot.lane.b32.xlu0 %v206_v8, %s693_s10  ;;  %211 = vrot.lane.b32.xlu1 %v206_v8, %s694_s11  ;;  %p621_p3 = por %p620_p2, %p619_p1 }
  0xa0   : > { %p622_p5 = pnand %p621_p3, %p615_p0 }
  0xa2   : > { %226 = vrot.lane.b32.xlu0 %v206_v8, %s695_s18  ;;  %217 = vrot.lane.b32.xlu1 %v206_v8, %s696_s19 }
  0xa6   : > { %223 = vrot.lane.b32.xlu1 %v206_v8, %s697_s21 }
 0x10c   : > { %v215_v13 = vpop.permute.xlu0 %214  ;;  %v209_v14 = vpop.permute.xlu1 %208 }
 0x10d   : > { %v245_v26 = vcombine.low %v209_v14, %v215_v13  ;;  %v246_v36 = vcombine.high %v209_v14, %v215_v13 }
 0x10f   : > { %v253_v32 = vrot.slane %v245_v26, %v236_v25  ;;  %v260_v48 = vrot.slane %v246_v36, %v236_v25 }
 0x110   : > { %v221_v17 = vpop.permute.xlu0 %220  ;;  %v212_v18 = vpop.permute.xlu1 %211 }
 0x111   : > { %v229_v22 = vcombine.low %v206_v8, %v212_v18  ;;  %v230_v33 = vcombine.high %v206_v8, %v212_v18 }
 0x113   : > { %v237_v28 = vrot.slane %v229_v22, %v236_v25  ;;  %v244_v43 = vrot.slane %v230_v33, %v236_v25 }
 0x114   : > { %v227_v23 = vpop.permute.xlu0 %226  ;;  %v218_v24 = vpop.permute.xlu1 %217 }
 0x115   : > { %v277_v29 = vcombine.low %v221_v17, %v227_v23  ;;  %v278_v30 = vcombine.high %v221_v17, %v227_v23  ;;  %v293_v38 = vcombine.low %v237_v28, %v253_v32  ;;  %v294_v44 = vcombine.high %v237_v28, %v253_v32 }
 0x116   : > { %v309_v52 = vcombine.low %v244_v43, %v260_v48  ;;  %v310_v62 = vcombine.high %v244_v43, %v260_v48 }
 0x117   : > { %v285_v39 = vrot.slane %v277_v29, %v236_v25  ;;  %v292_v42 = vrot.slane %v278_v30, %v236_v25  ;;  %v301_v49 = vrot.slane %v293_v38, %v300_v37  ;;  %v308_v55 = vrot.slane %v294_v44, %v300_v37 }
 0x118   : > { %v224_v31 = vpop.permute.xlu1 %223  ;;  %v317_v63 = vrot.slane %v309_v52, %v300_v37  ;;  %v324_v5 = vrot.slane %v310_v62, %v300_v37 }
 0x119   : > { %v261_v34 = vcombine.low %v218_v24, %v224_v31  ;;  %v262_v35 = vcombine.high %v218_v24, %v224_v31 }
 0x11b   : > { %v269_v40 = vrot.slane %v261_v34, %v236_v25  ;;  %v276_v41 = vrot.slane %v262_v35, %v236_v25 }
 0x11d   : > { %v325_v45 = vcombine.low %v269_v40, %v285_v39  ;;  %v326_v46 = vcombine.high %v269_v40, %v285_v39  ;;  %v341_v47 = vcombine.low %v276_v41, %v292_v42  ;;  %v342_v56 = vcombine.high %v276_v41, %v292_v42 }
 0x11f   : > { %v333_v50 = vrot.slane %v325_v45, %v300_v37  ;;  %v340_v51 = vrot.slane %v326_v46, %v300_v37  ;;  %v349_v57 = vrot.slane %v341_v47, %v300_v37  ;;  %v356_v0 = vrot.slane %v342_v56, %v300_v37 }
 0x121   : > { %v358_v53 = vcombine.high %v301_v49, %v333_v50  ;;  %v357_v54 = vcombine.low %v301_v49, %v333_v50  ;;  %v359_v60 = vcombine.low %v308_v55, %v340_v51  ;;  %v360_v61 = vcombine.high %v308_v55, %v340_v51 }
 0x122   : > { %v361_v3 = vcombine.low %v317_v63, %v349_v57  ;;  %v362_v4 = vcombine.high %v317_v63, %v349_v57  ;;  %v363_v8 = vcombine.low %v324_v5, %v356_v0  ;;  %v364_v9 = vcombine.high %v324_v5, %v356_v0 }
 0x123   : > { %v369_v58 = vsel %vm365_vm0, %v358_v53, -inf  ;;  %v366_v59 = vsel %vm365_vm0, %v357_v54, -inf  ;;  %v372_v1 = vsel %vm365_vm0, %v359_v60, -inf  ;;  %v375_v2 = vsel %vm365_vm0, %v360_v61, -inf }
 0x124   : > { %370 = vmax.xlane.f32.xlu0 %v369_v58  ;;  %367 = vmax.xlane.f32.xlu1 %v366_v59  ;;  %v378_v6 = vsel %vm365_vm0, %v361_v3, -inf  ;;  %v381_v7 = vsel %vm365_vm0, %v362_v4, -inf  ;;  %v384_v10 = vsel %vm365_vm0, %v363_v8, -inf  ;;  %v387_v11 = vsel %vm365_vm0, %v364_v9, -inf }
 0x128   : > { %373 = vmax.xlane.f32.xlu0 %v372_v1  ;;  %376 = vmax.xlane.f32.xlu1 %v375_v2 }
 0x12c   : > { %379 = vmax.xlane.f32.xlu0 %v378_v6  ;;  %382 = vmax.xlane.f32.xlu1 %v381_v7 }
 0x130   : > { %385 = vmax.xlane.f32.xlu0 %v384_v10  ;;  %388 = vmax.xlane.f32.xlu1 %v387_v11 }
 0x1ad   : > { %v371_v13 = vpop.xlane.xlu0 %370  ;;  %v368_v14 = vpop.xlane.xlu1 %367 }
 0x1ae   : > { %v407_v15 = vrot.slane %v371_v13, %v787_v12  ;;  %v403_v16 = vrot.slane %v368_v14, %v787_v12 }
 0x1b0   : > { %v433_v20 = vsel %vm432_vm1, %v407_v15, %v403_v16 }
 0x1b1   : > { %v374_v17 = vpop.xlane.xlu0 %373  ;;  %v377_v18 = vpop.xlane.xlu1 %376 }
 0x1b2   : > { %v411_v19 = vrot.slane %v374_v17, %v787_v12  ;;  %v415_v21 = vrot.slane %v377_v18, %v787_v12 }
 0x1b4   : > { %v435_v22 = vsel %vm434_vm2, %v411_v19, %v433_v20 }
 0x1b5   : > { %v380_v23 = vpop.xlane.xlu0 %379  ;;  %v383_v24 = vpop.xlane.xlu1 %382  ;;  %v437_v26 = vsel %vm436_vm3, %v415_v21, %v435_v22 }
 0x1b6   : > { %v419_v25 = vrot.slane %v380_v23, %v787_v12  ;;  %v423_v27 = vrot.slane %v383_v24, %v787_v12 }
 0x1b8   : > { %v439_v28 = vsel %vm438_vm4, %v419_v25, %v437_v26 }
 0x1b9   : > { %v386_v29 = vpop.xlane.xlu0 %385  ;;  %v389_v30 = vpop.xlane.xlu1 %388  ;;  %v441_v33 = vsel %vm440_vm5, %v423_v27, %v439_v28 }
 0x1ba   : > { %v427_v31 = vrot.slane %v386_v29, %v787_v12  ;;  %v431_v32 = vrot.slane %v389_v30, %v787_v12 }
 0x1bc   : > { %v443_v34 = vsel %vm442_vm6, %v427_v31, %v441_v33 }
 0x1bd   : > { %v445_v35 = vsel %vm444_vm7, %v431_v32, %v443_v34 }
 0x1be   : > { %448 = vst.msk [vmem:[%s183_s28] sm:$0xff] %vm447_vm8, %v445_v35 }
 0x1bf   : > { %625 = shalt.err (!%p622_p5)
}
 0x1c0   : > { %s626_s10 = scalar_lea.hbm %s812_s5, 128  ;;  %s630_s19 = scalar_lea.hbm %s857_s3, 256 }
 0x1c1   : > { %p627_p6 = scmp.ne.s32.totalorder %s812_s5, %s626_s10  ;;  %p631_p10 = scmp.lt.s32.totalorder %s812_s5, %s857_s3 }
 0x1c2   : > { %p632_p11 = scmp.lt.s32.totalorder %s630_s19, %s626_s10 }
 0x1c3   : > { %p628_p7 = pnand %p627_p6, %p761_p4 }
 0x1c4   : > { %p633_p12 = por %p632_p11, %p631_p10 }
 0x1c5   : > { %p629_p9 = pneg %p628_p7 }
 0x1c7   : > { %p634_p13 = pnand %p633_p12, %p629_p9 }
 0x1c9   : > { %637 = shalt.err (!%p634_p13)
}
 0x1ca   : > { %546 = dma.vmem_to_hbm [thread:$0]  (%p761_p4), %s465_s29, 128, %s812_s5, %s450_s15  }
 0x1cb PF: > { %p552_p0 = scmp.ge.s32.totalorder %s688_s17, 2  ;;  %s476_s26 = sand.u32 1, %s668_s12  }
 0x1cc   : > { %s477_s27 = scalar_lea.sflag [#allocation3], %s476_s26 }
 0x1cd   : > { %p549_p1 = pnand %p552_p0, %p768_p8 }
 0x1cf   : > { %p550_p2 = pneg %p549_p1 }
 0x1d1   : > { %663 = dma.done.wait (%p550_p2), %s477_s27, 128  }
 0x1d2   : > { %665 = vsyncadd (%p550_p2), %s477_s27, 4294967168  ;;  %s16_s17 = sadd.s32 1, %s688_s17   ;;  %s860_s12 = smov %s672_s13 }
 0x1d3   : > { %p13_p3 = scmp.ge.s32.totalorder %s16_s17, 4   ;;  %s861_s13 = smov %s676_s14 }
 0x1d4   : > { %s862_s14 = smov %s774_s25  ;;  %s863_s15 = smov %s684_s16 }
 0x1d5   : > { %s864_s16 = smov %s866_s20  ;;  %15 = sbr.rel (!%p13_p3) target bundleno = 4 (0x4), region = 67 }
 0x1da   :  { %482 = vsyncpa [#allocation3], 1 }
 0x1db   :  { %484 = vsyncpa [#allocation3 + $0x1], 1 }

</bundles_post_ra>
